<compile_context>
chip_gen: v7x
topology: tpu7x:2x2x1
jax: 0.10.0
libtpu: 0.0.40
codegen_flags: <defaults>
</compile_context>

<pallas_src>
import jax
import jax.numpy as jnp
from jax.experimental import pallas as pl
from jax.experimental.pallas import tpu as pltpu


# ----------------------------------------------------------------------------
# Coalesced HBM->HBM DMA copy kernel (only used when a fresh buffer is wanted).
# ----------------------------------------------------------------------------
def _dma_copy_kernel(*args):
    """args = (in_ref_0..in_ref_{n-1}, out_ref_0..out_ref_{n-1}, sem).

    Each ref lives in HBM (memory_space=pl.ANY); we issue one async DMA per
    array, let them all stream concurrently, then wait for completion.
    """
    sem = args[-1]
    refs = args[:-1]
    n = len(refs) // 2
    copies = [
        pltpu.make_async_copy(refs[i], refs[n + i], sem.at[i]) for i in range(n)
    ]
    for c in copies:   # start all DMAs (overlap on the DMA queues)
        c.start()
    for c in copies:   # then wait for all of them
        c.wait()


def _dma_copy_arrays(arrays):
    """Materialize fresh copies of `arrays` with ONE pallas_call (direct DMA)."""
    n = len(arrays)
    if n == 0:
        return ()
    total_bytes = sum(int(a.size) * jnp.dtype(a.dtype).itemsize for a in arrays)
    out = pl.pallas_call(
        _dma_copy_kernel,
        out_shape=tuple(jax.ShapeDtypeStruct(a.shape, a.dtype) for a in arrays),
        in_specs=[pl.BlockSpec(memory_space=pl.ANY)] * n,     # raw HBM refs
        out_specs=tuple(pl.BlockSpec(memory_space=pl.ANY) for _ in range(n)),
        scratch_shapes=[pltpu.SemaphoreType.DMA((n,))],
        cost_estimate=pl.CostEstimate(
            flops=0, transcendentals=0, bytes_accessed=2 * total_bytes),
    )(*arrays)
    if not isinstance(out, (tuple, list)):
        out = (out,)
    return tuple(out)


def _is_copyable_array(leaf):
    return hasattr(leaf, "shape") and hasattr(leaf, "dtype")


def _materialize_one(tree):
    """Copy every array leaf of one input via a single coalesced DMA call.

    Non-array leaves (Python scalars, strings, ...) pass through untouched;
    0-d and empty arrays pass through as-is (nothing to DMA).
    """
    leaves, treedef = jax.tree_util.tree_flatten(tree)
    idx, arrs = [], []
    for i, leaf in enumerate(leaves):
        if _is_copyable_array(leaf):
            a = jnp.asarray(leaf)
            if a.ndim >= 1 and a.size > 0:
                idx.append(i)
                arrs.append(a)
    copies = _dma_copy_arrays(tuple(arrs))
    new_leaves = list(leaves)
    for i, c in zip(idx, copies):
        new_leaves[i] = c
    return jax.tree_util.tree_unflatten(treedef, new_leaves)


# ----------------------------------------------------------------------------
# Public wrapper: EmptyTransform.forward
# ----------------------------------------------------------------------------
def empty_transform(*inputs, materialize=False):
    """JAX equivalent of EmptyTransform.forward(*inputs).

    Default (materialize=False): exact passthrough — the same objects are
    returned, no Pallas/XLA work at all (the optimal identity on every TPU).

    materialize=True: every array leaf of each input is copied to a fresh HBM
    buffer via one coalesced HBM->HBM DMA Pallas kernel per input.
    """
    if materialize:
        outputs = tuple(_materialize_one(inp) for inp in inputs)
    else:
        outputs = inputs
    return outputs if len(outputs) > 1 else outputs[0]


if __name__ == "__main__":
    key = jax.random.PRNGKey(0)
    k_img, k_box = jax.random.split(key)

    # Typical detection-transform inputs: an NCHW image, boxes and labels.
    x = jax.random.normal(k_img, (2, 4, 16, 16), dtype=jnp.float32)   # NCHW
    boxes = jax.random.uniform(k_box, (8, 4), dtype=jnp.float32)
    labels = jax.random.randint(jax.random.PRNGKey(1), (8,), 0, 80, dtype=jnp.int32)

    # Fast path (default): exact passthrough — identical objects, zero work.
    y_single = empty_transform(x)
    assert y_single is x
    y_multi = empty_transform(x, boxes)
    assert isinstance(y_multi, tuple) and len(y_multi) == 2
    assert y_multi[0] is x and y_multi[1] is boxes

    # Pallas path: one coalesced HBM->HBM DMA copy per input, fresh buffers.
    xc = jax.block_until_ready(empty_transform(x, materialize=True))
    assert xc.shape == x.shape and xc.dtype == x.dtype
    assert bool(jnp.all(xc == x))

    targets = {"boxes": boxes, "labels": labels}
    mc = empty_transform(x, targets, materialize=True)
    mc = jax.block_until_ready(mc)
    assert isinstance(mc, tuple) and len(mc) == 2
    assert bool(jnp.all(mc[0] == x))
    assert bool(jnp.all(mc[1]["boxes"] == boxes))
    assert bool(jnp.all(mc[1]["labels"] == labels))

    print("KERNEL_OK")
</pallas_src>

<mosaic_0001>
module attributes {stable_mosaic.version = 11 : i64} {
  func.func @_dma_copy_kernel(%arg0: memref<2x4x16x16xf32, #tpu.memory_space<any>>, %arg1: memref<2x4x16x16xf32, #tpu.memory_space<any>>, %arg2: memref<1x!tpu.dma_semaphore, #tpu.memory_space<semaphore_mem>>) attributes {dimension_semantics = [], scalar_prefetch = 0 : i64, scratch_operands = 1 : i64, tpu.core_type = #tpu.core_type<tc>} {
    %c0_i32 = arith.constant 0 : i32
    %0 = tpu.memref_slice %arg2[%c0_i32] : memref<1x!tpu.dma_semaphore, #tpu.memory_space<semaphore_mem>> -> memref<1x!tpu.dma_semaphore, #tpu.memory_space<semaphore_mem>>
    %1 = tpu.memref_squeeze %0 : memref<1x!tpu.dma_semaphore, #tpu.memory_space<semaphore_mem>> -> memref<!tpu.dma_semaphore, #tpu.memory_space<semaphore_mem>>
    tpu.enqueue_dma source(%arg0 : memref<2x4x16x16xf32, #tpu.memory_space<any>>) target(%arg1 : memref<2x4x16x16xf32, #tpu.memory_space<any>>) target_semaphore(%1 : memref<!tpu.dma_semaphore, #tpu.memory_space<semaphore_mem>>)
    %c0_i32_0 = arith.constant 0 : i32
    %2 = tpu.memref_slice %arg2[%c0_i32_0] : memref<1x!tpu.dma_semaphore, #tpu.memory_space<semaphore_mem>> -> memref<1x!tpu.dma_semaphore, #tpu.memory_space<semaphore_mem>>
    %3 = tpu.memref_squeeze %2 : memref<1x!tpu.dma_semaphore, #tpu.memory_space<semaphore_mem>> -> memref<!tpu.dma_semaphore, #tpu.memory_space<semaphore_mem>>
    tpu.wait_dma2 semaphore(%3 : memref<!tpu.dma_semaphore, #tpu.memory_space<semaphore_mem>>) src(%arg0 : memref<2x4x16x16xf32, #tpu.memory_space<any>>) dst(%arg1 : memref<2x4x16x16xf32, #tpu.memory_space<any>>)
    return
  }
}

</mosaic_0001>

<bundles_post_ra>
// kernel: tpu_custom_call.1
= control target key start
LH: loop header
LB: loop body
LE: loop exit
PB: predicated region body
PF: predicated region fallthrough
CT: control target
= control target key end

     0   :  { %s36_s6 = smov [#allocation2]   ;;  %s37_s7 = smov [#allocation3]   ;;  %s55_s0 = inlined_call_operand.hbm [shape: f32[2,4,16,16], index: 0, kind: input, shape index: {}]   ;;  %s56_s1 = inlined_call_operand.hbm [shape: f32[2,4,16,16], index: 1, kind: output, shape index: {}]  }
   0x1   :  { %s38_s8 = smov 0  }
   0x2   :  { %18 = dma.general %s55_s0, 2048, %s56_s1, %s36_s6, %s37_s7, [#allocation4], %s38_s8, 0  }
   0x3   :  { %34 = dma.done.wait [#allocation2], 2048 }
   0x4   :  { %35 = vsyncadd [#allocation2], 4294965248 }
   0x5   :  { %24 = vsyncmov [#allocation2] }
   0x8   :  { %s25_s13 = vpop.sfrf %24 }
   0x9   :  { %p30_p0 = scmp.ne.s32.totalorder %s25_s13, 0 }
   0xb   :  { %29 = shalt.err (%p30_p0)  }

</bundles_post_ra>
